<compile_context>
chip_gen: v7x
topology: tpu7x:2x2x1
jax: 0.10.0
libtpu: 0.0.40
codegen_flags: <defaults>
</compile_context>

<pallas_src>
import math

import numpy as np
import jax
import jax.numpy as jnp
from jax import lax
from jax.experimental import pallas as pl
from jax.experimental.pallas import tpu as pltpu

POOL = 4
EPS = 1e-5


def _adaptive_windows(in_size, out_size):
    """Static (start, end) windows identical to torch's adaptive pooling."""
    wins = []
    for i in range(out_size):
        s = (i * in_size) // out_size
        e = -(-((i + 1) * in_size) // out_size)  # ceil
        wins.append((s, e))
    return wins


def convlinconv_forward(x_nchw, params, *, stride=1):
    """Fused ConvLinConv forward as one Pallas kernel. NCHW in / NCHW out."""
    x_nchw = x_nchw.astype(jnp.float32)
    B, C_in, H, W = (int(d) for d in x_nchw.shape)
    w3 = params["w3_hwio"]                      # (K, K, C_in, C_lin)
    K, C_lin = int(w3.shape[0]), int(w3.shape[3])
    w_lin = params["w_lin"]                     # (C_out, C_lin * 16)
    C_out = int(w_lin.shape[0])

    Hc, Wc = H - K + 1, W - K + 1               # valid 3x3 conv, stride 1
    NP = B * Hc * Wc
    KKC = K * K * C_in

    x_nhwc = jnp.transpose(x_nchw, (0, 2, 3, 1))

    # ---------------- conv branch (wrapper-side layout plumbing only) ----------------
    # ReLU BEFORE im2col duplication, and cast to bf16 before shipping.
    xr = jnp.maximum(x_nhwc, 0.0).astype(jnp.bfloat16)
    # Lane-dense im2col: patches2[b*Hc+i, j*KKC + (dy*K+dx)*C_in + ci] = relu(x)[b,i+dy,j+dx,ci]
    cols = [xr[:, dy:dy + Hc, j + dx, :]
            for j in range(Wc) for dy in range(K) for dx in range(K)]
    patches2 = jnp.concatenate(cols, axis=-1).reshape(B * Hc, Wc * KKC)

    # Block-diagonal (over Wc) conv weight so the conv dot emits (B*Hc, Wc*C_lin).
    w3_mat = w3.reshape(KKC, C_lin)
    wbig = jnp.kron(jnp.eye(Wc, dtype=jnp.float32), w3_mat).astype(jnp.bfloat16)

    # BN-stat lane combiner: per-channel average over (b,i,j), tiled back to (j',c) lanes.
    m_avg = jnp.asarray(np.kron(np.ones((Wc, Wc), np.float32),
                                np.eye(C_lin, dtype=np.float32)) / float(NP))   # (Wc*C_lin, Wc*C_lin)
    gamma_full = jnp.tile(params["gamma"].reshape(1, C_lin), (1, Wc))            # (1, Wc*C_lin)
    beta_full = jnp.tile(params["beta"].reshape(1, C_lin), (1, Wc))              # (1, Wc*C_lin)

    # AdaptiveAvgPool2d(4), factored: row matrix (h-windows, per batch) x lane matrix (w-windows).
    h_wins = _adaptive_windows(Hc, POOL)
    w_wins = _adaptive_windows(Wc, POOL)
    ph0 = np.zeros((POOL, Hc), np.float32)
    for i, (hs, he) in enumerate(h_wins):
        ph0[i, hs:he] = 1.0 / float(he - hs)
    ph = jnp.asarray(np.kron(np.eye(B, dtype=np.float32), ph0))                  # (B*4, B*Hc)
    pw0 = np.zeros((Wc, POOL), np.float32)
    for j, (ws, we) in enumerate(w_wins):
        pw0[ws:we, j] = 1.0 / float(we - ws)
    pw = np.kron(pw0, np.eye(C_lin, dtype=np.float32))                           # (Wc*C_lin, 4*C_lin)

    # Linear(64 -> C_out) in torch NCHW flatten order (f = c*16 + ip*4 + jp), with the
    # w-direction pooling folded in offline:  PWS = PW @ Wstack.
    w_stack = jnp.transpose(w_lin.reshape(C_out, C_lin, POOL, POOL),
                            (3, 1, 2, 0)).reshape(POOL * C_lin, POOL * C_out)    # (4*C_lin, 4*C_out)
    pws = jnp.dot(jnp.asarray(pw), w_stack)                                      # (Wc*C_lin, 4*C_out)
    # Mask keeping only the ip'==ip blocks of T = pooled_rows @ PWS.
    dm = jnp.asarray(np.kron(np.ones((B, 1), np.float32),
                             np.kron(np.eye(POOL, dtype=np.float32),
                                     np.ones((1, C_out), np.float32))))          # (B*4, 4*C_out)

    # ---------------- 1x1-conv branch + output broadcast ----------------
    xs = x_nhwc[:, ::stride, ::stride, :]                      # NOT relu'd
    Ho, Wo = int(xs.shape[1]), int(xs.shape[2])
    xs2d = xs.reshape(B * Ho, Wo * C_in).astype(jnp.bfloat16)  # lane-dense rows (b,h)
    w1big = jnp.kron(jnp.eye(Wo, dtype=jnp.float32), params["w1"]).astype(jnp.bfloat16)  # (Wo*C_in, Wo*C_out)
    b1big = jnp.tile(params["b1"].reshape(1, C_out), (1, Wo))                    # (1, Wo*C_out)

    # Collapsed broadcast/reorder constants (precomputed offline, 2 dots in-kernel).
    re = jnp.asarray(np.kron(np.eye(B, dtype=np.float32),
                             np.ones((Ho, POOL), np.float32)))                   # (B*Ho, B*4)
    sc = jnp.asarray(np.kron(np.ones((POOL, 1), np.float32),
                             np.kron(np.ones((1, Wo), np.float32),
                                     np.eye(C_out, dtype=np.float32))))          # (4*C_out, Wo*C_out)
    bias_tile = jnp.tile(params["b_lin"].reshape(1, C_out), (1, Wo))             # (1, Wo*C_out)

    def kernel(patches_ref, wbig_ref, mavg_ref, gfull_ref, bfull_ref,
               ph_ref, pws_ref, dm_ref, re_ref, sc_ref, btile_ref,
               xs_ref, w1big_ref, b1big_ref, out_ref):
        f32 = jnp.float32

        # ---- ReLU'd 3x3 valid conv: one lane-dense bf16 MXU dot -> (B*Hc, Wc*C_lin) ----
        y = jnp.dot(patches_ref[...], wbig_ref[...], preferred_element_type=f32)

        # ---- BatchNorm2d training-mode batch stats (two-pass, sublane/XLU reduces) ----
        colsum = jnp.sum(y, axis=0, keepdims=True)                        # (1, Wc*C_lin)
        m_full = jnp.dot(colsum, mavg_ref[...], preferred_element_type=f32)   # per-channel mean, tiled
        centered = y - m_full
        sqsum = jnp.sum(centered * centered, axis=0, keepdims=True)
        var_full = jnp.dot(sqsum, mavg_ref[...], preferred_element_type=f32)  # biased var, tiled
        y_bn = centered * (gfull_ref[...] * lax.rsqrt(var_full + EPS)) + bfull_ref[...]

        # ---- AdaptiveAvgPool2d(4) + Linear + broadcast to output layout ----
        pooled_rows = jnp.dot(ph_ref[...], y_bn, preferred_element_type=f32)       # (B*4, Wc*C_lin)
        t = jnp.dot(pooled_rows, pws_ref[...], preferred_element_type=f32)         # (B*4, 4*C_out)
        t = t * dm_ref[...]                                                        # keep ip'==ip blocks
        lmid = jnp.dot(re_ref[...], t, preferred_element_type=f32)                 # (B*Ho, 4*C_out)
        l_full = jnp.dot(lmid, sc_ref[...], preferred_element_type=f32) + btile_ref[...]  # (B*Ho, Wo*C_out)

        # ---- 1x1 conv branch: one bf16 dot, already lane-dense ----
        r = jnp.dot(xs_ref[...], w1big_ref[...], preferred_element_type=f32) + b1big_ref[...]

        # ---- single unmasked lane-dense store ----
        out_ref[...] = l_full * r

    vmem = pl.BlockSpec(memory_space=pltpu.MemorySpace.VMEM)
    out2d = pl.pallas_call(
        kernel,
        out_shape=jax.ShapeDtypeStruct((B * Ho, Wo * C_out), jnp.float32),
        in_specs=[vmem] * 14,
        out_specs=vmem,
    )(patches2, wbig, m_avg, gamma_full, beta_full, ph, pws, dm, re, sc,
      bias_tile, xs2d, w1big, b1big)

    # back to NCHW (wrapper-side layout plumbing only)
    return jnp.transpose(out2d.reshape(B, Ho, Wo, C_out), (0, 3, 1, 2))


def init_params(key, C_in, C_out, *, lin_size=64, K=3):
    """Deterministic, PyTorch-default-style init of all module parameters."""
    C_lin = lin_size // 16
    k1, k2, k3, k4, k5 = jax.random.split(key, 5)
    fan3 = C_in * K * K
    w3 = jax.random.uniform(k1, (C_lin, C_in, K, K), jnp.float32,
                            -1.0 / math.sqrt(fan3), 1.0 / math.sqrt(fan3))
    w_lin = jax.random.uniform(k2, (C_out, lin_size), jnp.float32,
                               -1.0 / math.sqrt(lin_size), 1.0 / math.sqrt(lin_size))
    b_lin = jax.random.uniform(k3, (C_out,), jnp.float32,
                               -1.0 / math.sqrt(lin_size), 1.0 / math.sqrt(lin_size))
    w1 = jax.random.uniform(k4, (C_out, C_in, 1, 1), jnp.float32,
                            -1.0 / math.sqrt(C_in), 1.0 / math.sqrt(C_in))
    b1 = jax.random.uniform(k5, (C_out,), jnp.float32,
                            -1.0 / math.sqrt(C_in), 1.0 / math.sqrt(C_in))
    return {
        "w3_hwio": jnp.transpose(w3, (2, 3, 1, 0)),    # (K, K, C_in, C_lin)
        "gamma": jnp.ones((C_lin,), jnp.float32),
        "beta": jnp.zeros((C_lin,), jnp.float32),
        "w_lin": w_lin,
        "b_lin": b_lin,
        "w1": jnp.transpose(w1[:, :, 0, 0], (1, 0)),   # (C_in, C_out)
        "b1": b1,
    }


def ref_forward(x_nchw, p, *, stride=1):
    """Pure-JAX reference with identical semantics (for a sanity check)."""
    x = jnp.transpose(x_nchw, (0, 2, 3, 1)).astype(jnp.float32)
    B = x.shape[0]
    xr = jax.nn.relu(x)
    y = lax.conv_general_dilated(
        xr, p["w3_hwio"], (1, 1), "VALID",
        dimension_numbers=("NHWC", "HWIO", "NHWC"),
        precision=lax.Precision.HIGHEST)
    m = jnp.mean(y, axis=(0, 1, 2), keepdims=True)
    v = jnp.mean((y - m) ** 2, axis=(0, 1, 2), keepdims=True)
    y = (y - m) * lax.rsqrt(v + EPS) * p["gamma"] + p["beta"]
    Hc, Wc = y.shape[1], y.shape[2]
    hw, ww = _adaptive_windows(Hc, POOL), _adaptive_windows(Wc, POOL)
    rows = []
    for i in range(POOL):
        cols = []
        for j in range(POOL):
            (hs, he), (ws, we) = hw[i], ww[j]
            cols.append(jnp.mean(y[:, hs:he, ws:we, :], axis=(1, 2)))
        rows.append(jnp.stack(cols, axis=1))
    pooled = jnp.stack(rows, axis=1)                              # (B, 4, 4, C_lin)
    feat = jnp.transpose(pooled, (0, 3, 1, 2)).reshape(B, -1)     # torch NCHW flatten
    l = jnp.dot(feat, p["w_lin"].T, precision=lax.Precision.HIGHEST) + p["b_lin"]
    xs = x[:, ::stride, ::stride, :]
    r = jnp.einsum("bhwi,io->bhwo", xs, p["w1"],
                   precision=lax.Precision.HIGHEST) + p["b1"]
    out = l[:, None, None, :] * r
    return jnp.transpose(out, (0, 3, 1, 2))


if __name__ == "__main__":
    key = jax.random.PRNGKey(0)
    kx, kp = jax.random.split(key)
    B, C_in, H, W = 2, 4, 16, 16
    C_out, stride = 8, 1                       # ConvLinConv(is_3x3=True, 4, 8, stride=1)
    x = jax.random.normal(kx, (B, C_in, H, W), jnp.float32)
    params = init_params(kp, C_in, C_out)

    out = jax.block_until_ready(convlinconv_forward(x, params, stride=stride))
    ref = jax.block_until_ready(ref_forward(x, params, stride=stride))

    assert out.shape == (B, C_out, H, W), out.shape
    # Tolerance loosened vs. pure-f32 (5e-3) because the conv / 1x1-conv matmul
    # operands are shipped as bf16 (f32 accumulate) per the MXU perf guidance.
    max_err = float(jnp.max(jnp.abs(out - ref)))
    assert max_err < 2e-2, f"max abs error {max_err}"
    print("KERNEL_OK")
</pallas_src>

<mosaic_0001>
module attributes {stable_mosaic.version = 11 : i64} {
  func.func @kernel(%arg0: memref<28x504xbf16, #tpu.memory_space<vmem>>, %arg1: memref<504x56xbf16, #tpu.memory_space<vmem>>, %arg2: memref<56x56xf32, #tpu.memory_space<vmem>>, %arg3: memref<1x56xf32, #tpu.memory_space<vmem>>, %arg4: memref<1x56xf32, #tpu.memory_space<vmem>>, %arg5: memref<8x28xf32, #tpu.memory_space<vmem>>, %arg6: memref<56x32xf32, #tpu.memory_space<vmem>>, %arg7: memref<8x32xf32, #tpu.memory_space<vmem>>, %arg8: memref<32x8xf32, #tpu.memory_space<vmem>>, %arg9: memref<32x128xf32, #tpu.memory_space<vmem>>, %arg10: memref<1x128xf32, #tpu.memory_space<vmem>>, %arg11: memref<32x64xbf16, #tpu.memory_space<vmem>>, %arg12: memref<64x128xbf16, #tpu.memory_space<vmem>>, %arg13: memref<1x128xf32, #tpu.memory_space<vmem>>, %arg14: memref<32x128xf32, #tpu.memory_space<vmem>>) attributes {dimension_semantics = [], scalar_prefetch = 0 : i64, scratch_operands = 0 : i64, tpu.core_type = #tpu.core_type<tc>} {
    %c0 = arith.constant 0 : index
    %c0_0 = arith.constant 0 : index
    %0 = vector.load %arg0[%c0, %c0_0] : memref<28x504xbf16, #tpu.memory_space<vmem>>, vector<28x504xbf16>
    %c0_1 = arith.constant 0 : index
    %c0_2 = arith.constant 0 : index
    %1 = vector.load %arg1[%c0_1, %c0_2] : memref<504x56xbf16, #tpu.memory_space<vmem>>, vector<504x56xbf16>
    %cst = arith.constant dense<0.000000e+00> : vector<28x56xf32>
    %2 = tpu.matmul %0, %1, %cst {dimension_numbers = #tpu.dot_dimension_numbers<[1], [0], [0], [1], [0, 0, 1, 1], [], []>} : vector<28x504xbf16>, vector<504x56xbf16>, vector<28x56xf32> -> vector<28x56xf32>
    %cst_3 = arith.constant dense<0.000000e+00> : vector<56xf32>
    %3 = vector.multi_reduction <add>, %2, %cst_3 [0] : vector<28x56xf32> to vector<56xf32>
    %4 = vector.shape_cast %3 : vector<56xf32> to vector<1x56xf32>
    %c0_4 = arith.constant 0 : index
    %c0_5 = arith.constant 0 : index
    %5 = vector.load %arg2[%c0_4, %c0_5] : memref<56x56xf32, #tpu.memory_space<vmem>>, vector<56x56xf32>
    %cst_6 = arith.constant dense<0.000000e+00> : vector<1x56xf32>
    %6 = tpu.matmul %4, %5, %cst_6 {dimension_numbers = #tpu.dot_dimension_numbers<[1], [0], [0], [1], [0, 0, 1, 1], [], []>} : vector<1x56xf32>, vector<56x56xf32>, vector<1x56xf32> -> vector<1x56xf32>
    %7 = vector.broadcast %6 : vector<1x56xf32> to vector<28x56xf32>
    %8 = arith.subf %2, %7 : vector<28x56xf32>
    %9 = arith.mulf %8, %8 : vector<28x56xf32>
    %cst_7 = arith.constant dense<0.000000e+00> : vector<56xf32>
    %10 = vector.multi_reduction <add>, %9, %cst_7 [0] : vector<28x56xf32> to vector<56xf32>
    %11 = vector.shape_cast %10 : vector<56xf32> to vector<1x56xf32>
    %c0_8 = arith.constant 0 : index
    %c0_9 = arith.constant 0 : index
    %12 = vector.load %arg2[%c0_8, %c0_9] : memref<56x56xf32, #tpu.memory_space<vmem>>, vector<56x56xf32>
    %cst_10 = arith.constant dense<0.000000e+00> : vector<1x56xf32>
    %13 = tpu.matmul %11, %12, %cst_10 {dimension_numbers = #tpu.dot_dimension_numbers<[1], [0], [0], [1], [0, 0, 1, 1], [], []>} : vector<1x56xf32>, vector<56x56xf32>, vector<1x56xf32> -> vector<1x56xf32>
    %c0_11 = arith.constant 0 : index
    %c0_12 = arith.constant 0 : index
    %14 = vector.load %arg3[%c0_11, %c0_12] : memref<1x56xf32, #tpu.memory_space<vmem>>, vector<1x56xf32>
    %cst_13 = arith.constant 9.99999974E-6 : f32
    %15 = vector.broadcast %cst_13 : f32 to vector<1x56xf32>
    %16 = arith.addf %13, %15 : vector<1x56xf32>
    %17 = math.rsqrt %16 : vector<1x56xf32>
    %18 = arith.mulf %14, %17 : vector<1x56xf32>
    %19 = vector.broadcast %18 : vector<1x56xf32> to vector<28x56xf32>
    %20 = arith.mulf %8, %19 : vector<28x56xf32>
    %c0_14 = arith.constant 0 : index
    %c0_15 = arith.constant 0 : index
    %21 = vector.load %arg4[%c0_14, %c0_15] : memref<1x56xf32, #tpu.memory_space<vmem>>, vector<1x56xf32>
    %22 = vector.broadcast %21 : vector<1x56xf32> to vector<28x56xf32>
    %23 = arith.addf %20, %22 : vector<28x56xf32>
    %c0_16 = arith.constant 0 : index
    %c0_17 = arith.constant 0 : index
    %24 = vector.load %arg5[%c0_16, %c0_17] : memref<8x28xf32, #tpu.memory_space<vmem>>, vector<8x28xf32>
    %cst_18 = arith.constant dense<0.000000e+00> : vector<8x56xf32>
    %25 = tpu.matmul %24, %23, %cst_18 {dimension_numbers = #tpu.dot_dimension_numbers<[1], [0], [0], [1], [0, 0, 1, 1], [], []>} : vector<8x28xf32>, vector<28x56xf32>, vector<8x56xf32> -> vector<8x56xf32>
    %c0_19 = arith.constant 0 : index
    %c0_20 = arith.constant 0 : index
    %26 = vector.load %arg6[%c0_19, %c0_20] : memref<56x32xf32, #tpu.memory_space<vmem>>, vector<56x32xf32>
    %cst_21 = arith.constant dense<0.000000e+00> : vector<8x32xf32>
    %27 = tpu.matmul %25, %26, %cst_21 {dimension_numbers = #tpu.dot_dimension_numbers<[1], [0], [0], [1], [0, 0, 1, 1], [], []>} : vector<8x56xf32>, vector<56x32xf32>, vector<8x32xf32> -> vector<8x32xf32>
    %c0_22 = arith.constant 0 : index
    %c0_23 = arith.constant 0 : index
    %28 = vector.load %arg7[%c0_22, %c0_23] : memref<8x32xf32, #tpu.memory_space<vmem>>, vector<8x32xf32>
    %29 = arith.mulf %27, %28 : vector<8x32xf32>
    %c0_24 = arith.constant 0 : index
    %c0_25 = arith.constant 0 : index
    %30 = vector.load %arg8[%c0_24, %c0_25] : memref<32x8xf32, #tpu.memory_space<vmem>>, vector<32x8xf32>
    %cst_26 = arith.constant dense<0.000000e+00> : vector<32x32xf32>
    %31 = tpu.matmul %30, %29, %cst_26 {dimension_numbers = #tpu.dot_dimension_numbers<[1], [0], [0], [1], [0, 0, 1, 1], [], []>} : vector<32x8xf32>, vector<8x32xf32>, vector<32x32xf32> -> vector<32x32xf32>
    %c0_27 = arith.constant 0 : index
    %c0_28 = arith.constant 0 : index
    %32 = vector.load %arg9[%c0_27, %c0_28] : memref<32x128xf32, #tpu.memory_space<vmem>>, vector<32x128xf32>
    %cst_29 = arith.constant dense<0.000000e+00> : vector<32x128xf32>
    %33 = tpu.matmul %31, %32, %cst_29 {dimension_numbers = #tpu.dot_dimension_numbers<[1], [0], [0], [1], [0, 0, 1, 1], [], []>} : vector<32x32xf32>, vector<32x128xf32>, vector<32x128xf32> -> vector<32x128xf32>
    %c0_30 = arith.constant 0 : index
    %c0_31 = arith.constant 0 : index
    %34 = vector.load %arg10[%c0_30, %c0_31] : memref<1x128xf32, #tpu.memory_space<vmem>>, vector<1x128xf32>
    %35 = vector.broadcast %34 : vector<1x128xf32> to vector<32x128xf32>
    %36 = arith.addf %33, %35 : vector<32x128xf32>
    %c0_32 = arith.constant 0 : index
    %c0_33 = arith.constant 0 : index
    %37 = vector.load %arg11[%c0_32, %c0_33] : memref<32x64xbf16, #tpu.memory_space<vmem>>, vector<32x64xbf16>
    %c0_34 = arith.constant 0 : index
    %c0_35 = arith.constant 0 : index
    %38 = vector.load %arg12[%c0_34, %c0_35] : memref<64x128xbf16, #tpu.memory_space<vmem>>, vector<64x128xbf16>
    %cst_36 = arith.constant dense<0.000000e+00> : vector<32x128xf32>
    %39 = tpu.matmul %37, %38, %cst_36 {dimension_numbers = #tpu.dot_dimension_numbers<[1], [0], [0], [1], [0, 0, 1, 1], [], []>} : vector<32x64xbf16>, vector<64x128xbf16>, vector<32x128xf32> -> vector<32x128xf32>
    %c0_37 = arith.constant 0 : index
    %c0_38 = arith.constant 0 : index
    %40 = vector.load %arg13[%c0_37, %c0_38] : memref<1x128xf32, #tpu.memory_space<vmem>>, vector<1x128xf32>
    %41 = vector.broadcast %40 : vector<1x128xf32> to vector<32x128xf32>
    %42 = arith.addf %39, %41 : vector<32x128xf32>
    %43 = arith.mulf %36, %42 : vector<32x128xf32>
    %c0_39 = arith.constant 0 : index
    %c0_40 = arith.constant 0 : index
    %44 = vector.load %arg14[%c0_39, %c0_40] : memref<32x128xf32, #tpu.memory_space<vmem>>, vector<32x128xf32>
    tpu.vector_store %arg14[%c0_39, %c0_40], %43 {strides = array<i32>} : memref<32x128xf32, #tpu.memory_space<vmem>>, vector<32x128xf32>,
    return
  }
}

</mosaic_0001>

<bundles_post_ra>
// kernel: tpu_custom_call.1
= control target key start
LH: loop header
LB: loop body
LE: loop exit
PB: predicated region body
PF: predicated region fallthrough
CT: control target
= control target key end

     0   :  { %vm354_vm0 = vcmask 1043456   ;;  %vm347_vm1 = vcmask 982016   ;;  %s1924_s0 = inlined_call_operand.vmem [shape: bf16[28,504], index: 0, kind: input, shape index: {}]   ;;  %s1925_s1 = inlined_call_operand.vmem [shape: bf16[504,56], index: 1, kind: input, shape index: {}]   ;;  %s1926_s2 = inlined_call_operand.vmem [shape: f32[56,56], index: 2, kind: input, shape index: {}]   ;;  %s1927_s3 = inlined_call_operand.vmem [shape: f32[1,56], index: 3, kind: input, shape index: {}]   ;;  %s1928_s4 = inlined_call_operand.vmem [shape: f32[1,56], index: 4, kind: input, shape index: {}]   ;;  %s1929_s5 = inlined_call_operand.vmem [shape: f32[8,28], index: 5, kind: input, shape index: {}]   ;;  %s1930_s6 = inlined_call_operand.vmem [shape: f32[56,32], index: 6, kind: input, shape index: {}]   ;;  %s1931_s7 = inlined_call_operand.vmem [shape: f32[8,32], index: 7, kind: input, shape index: {}]   ;;  %s1932_s8 = inlined_call_operand.vmem [shape: f32[32,8], index: 8, kind: input, shape index: {}]   ;;  %s1933_s9 = inlined_call_operand.vmem [shape: f32[32,128], index: 9, kind: input, shape index: {}]   ;;  %s1934_s10 = inlined_call_operand.vmem [shape: f32[1,128], index: 10, kind: input, shape index: {}]   ;;  %s1935_s11 = inlined_call_operand.vmem [shape: bf16[32,64], index: 11, kind: input, shape index: {}]   ;;  %s1936_s12 = inlined_call_operand.vmem [shape: bf16[64,128], index: 12, kind: input, shape index: {}]   ;;  %s1937_s13 = inlined_call_operand.vmem [shape: f32[1,128], index: 13, kind: input, shape index: {}]   ;;  %s1938_s14 = inlined_call_operand.hbm [shape: f32[32,128], index: 14, kind: output, shape index: {}]  }
   0x1   :  { %v1493_v0 = vld [vmem:[%s1925_s1 + $0x40] sm:$0xff]   ;;  %v1497_v4 = vld [vmem:[%s1925_s1 + $0x48] sm:$0xff]   ;;  %v1501_v8 = vld [vmem:[%s1925_s1 + $0x50] sm:$0xff]  }
   0x2   :  { %v1494_v1 = vld [vmem:[%s1925_s1 + $0xc0] sm:$0xff]   ;;  %1243 = vmatprep.subr.bf16.mxu0 %v1493_v0  ;;  %v1498_v5 = vld [vmem:[%s1925_s1 + $0xc8] sm:$0xff]   ;;  %v1502_v9 = vld [vmem:[%s1925_s1 + $0xd0] sm:$0xff]  }
   0x3   :  { %v1495_v2 = vld [vmem:[%s1925_s1] sm:$0xff]   ;;  %1271 = vmatprep.subr.bf16.mxu1 %v1494_v1  ;;  %v1499_v6 = vld [vmem:[%s1925_s1 + $0x8] sm:$0xff]   ;;  %v1503_v10 = vld [vmem:[%s1925_s1 + $0x10] sm:$0xff]  }
   0x4   :  { %v1496_v3 = vld [vmem:[%s1925_s1 + $0x80] sm:$0xff]   ;;  %1244 = vmatpush3.bf16.msra.mxu0 %v1495_v2  ;;  %v1500_v7 = vld [vmem:[%s1925_s1 + $0x88] sm:$0xff]   ;;  %v1504_v11 = vld [vmem:[%s1925_s1 + $0x90] sm:$0xff]  }
   0x5   :  { %1272 = vmatpush3.bf16.msra.mxu1 %v1496_v3  ;;  %1245 = vmatprep.subr.bf16.mxu0 %v1497_v4  ;;  %v1505_v12 = vld [vmem:[%s1925_s1 + $0x58] sm:$0xff]   ;;  %v1509_v16 = vld [vmem:[%s1925_s1 + $0x60] sm:$0xff]   ;;  %v1513_v20 = vld [vmem:[%s1925_s1 + $0x68] sm:$0xff]  }
   0x6   :  { %1273 = vmatprep.subr.bf16.mxu1 %v1498_v5  ;;  %v1506_v13 = vld [vmem:[%s1925_s1 + $0xd8] sm:$0xff]   ;;  %v1510_v17 = vld [vmem:[%s1925_s1 + $0xe0] sm:$0xff]   ;;  %v1514_v21 = vld [vmem:[%s1925_s1 + $0xe8] sm:$0xff]  }
   0x7   :  { %v1507_v14 = vld [vmem:[%s1925_s1 + $0x18] sm:$0xff]   ;;  %v1511_v18 = vld [vmem:[%s1925_s1 + $0x20] sm:$0xff]   ;;  %v1515_v22 = vld [vmem:[%s1925_s1 + $0x28] sm:$0xff]  }
   0x8   :  { %1246 = vmatpush3.bf16.msra.mxu0 %v1499_v6  ;;  %v1508_v15 = vld [vmem:[%s1925_s1 + $0x98] sm:$0xff]   ;;  %v1512_v19 = vld [vmem:[%s1925_s1 + $0xa0] sm:$0xff]   ;;  %v1516_v23 = vld [vmem:[%s1925_s1 + $0xa8] sm:$0xff]  }
   0x9   :  { %1274 = vmatpush3.bf16.msra.mxu1 %v1500_v7  ;;  %1247 = vmatprep.subr.bf16.mxu0 %v1501_v8  ;;  %v1517_v24 = vld [vmem:[%s1925_s1 + $0x70] sm:$0xff]   ;;  %v1521_v28 = vld [vmem:[%s1925_s1 + $0x78] sm:$0xff]  }
   0xa   :  { %1275 = vmatprep.subr.bf16.mxu1 %v1502_v9  ;;  %v1518_v25 = vld [vmem:[%s1925_s1 + $0xf0] sm:$0xff]   ;;  %v1522_v29 = vld [vmem:[%s1925_s1 + $0xf8] ss:$0 sps:$4 sm:$0xff]   ;;  %v1530_v35 = vld [vmem:[%s1924_s0 + $0xc] ss:$16 sps:$4 sm:$0xff]  }
   0xb   :  { %v1519_v26 = vld [vmem:[%s1925_s1 + $0x30] sm:$0xff]   ;;  %v1523_v30 = vld [vmem:[%s1925_s1 + $0x38] sm:$0xff]   ;;  %1217 = vmatprep.mubr.msk.bf16.mxu1 %vm347_vm1, %v1530_v35 }
   0xc   :  { %1248 = vmatpush3.bf16.msra.mxu0 %v1503_v10  ;;  %v1520_v27 = vld [vmem:[%s1925_s1 + $0xb0] sm:$0xff]   ;;  %v1524_v31 = vld [vmem:[%s1925_s1 + $0xb8] sm:$0xff]  }
   0xd   :  { %1276 = vmatpush3.bf16.msra.mxu1 %v1504_v11  ;;  %1249 = vmatprep.subr.bf16.mxu0 %v1505_v12  ;;  %v1525_v32 = vld [vmem:[%s1924_s0] ss:$16 sps:$4 sm:$0xff]   ;;  %v1527_v33 = vld [vmem:[%s1924_s0 + $0x4] ss:$16 sps:$4 sm:$0xff]   ;;  %v1528_v34 = vld [vmem:[%s1924_s0 + $0x8] ss:$16 sps:$4 sm:$0xff]  }
   0xe   :  { %1277 = vmatprep.subr.bf16.mxu1 %v1506_v13  ;;  %390 = vmatprep.mubr.bf16.mxu0 %v1527_v33  ;;  %v1531_v36 = vld [vmem:[%s1924_s0 + $0x24] ss:$16 sps:$4 sm:$0x3f]   ;;  %v1533_v37 = vld [vmem:[%s1924_s0 + $0x2c] ss:$16 sps:$4 sm:$0x3f]  }
   0xf   :  { %v1535_v38 = vld [vmem:[%s1924_s0 + $0x20] ss:$16 sps:$4 sm:$0x3f]   ;;  %v1536_v39 = vld [vmem:[%s1924_s0 + $0x28] ss:$16 sps:$4 sm:$0x3f]  }
  0x10   :  { %1250 = vmatpush3.bf16.msra.mxu0 %v1507_v14 }
  0x11   :  { %1278 = vmatpush3.bf16.msra.mxu1 %v1508_v15  ;;  %1251 = vmatprep.subr.bf16.mxu0 %v1509_v16 }
  0x12   :  { %1279 = vmatprep.subr.bf16.mxu1 %v1510_v17 }
  0x14   :  { %1252 = vmatpush3.bf16.msra.mxu0 %v1511_v18 }
  0x15   :  { %1280 = vmatpush3.bf16.msra.mxu1 %v1512_v19  ;;  %1253 = vmatprep.subr.bf16.mxu0 %v1513_v20 }
  0x16   :  { %1281 = vmatprep.subr.bf16.mxu1 %v1514_v21 }
  0x18   :  { %1254 = vmatpush3.bf16.msra.mxu0 %v1515_v22 }
  0x19   :  { %1282 = vmatpush3.bf16.msra.mxu1 %v1516_v23  ;;  %1255 = vmatprep.subr.bf16.mxu0 %v1517_v24 }
  0x1a   :  { %1283 = vmatprep.subr.bf16.mxu1 %v1518_v25 }
  0x1c   :  { %1256 = vmatpush3.bf16.msra.mxu0 %v1519_v26 }
  0x1d   :  { %1284 = vmatpush3.bf16.msra.mxu1 %v1520_v27  ;;  %1257 = vmatprep.subr.bf16.mxu0 %v1521_v28 }
  0x1e   :  { %1485 = vmatprep.subr.msk.bf16.mxu1 %vm354_vm0, %v1522_v29 }
  0x20   :  { %1258 = vmatpush3.bf16.msra.mxu0 %v1523_v30 }
  0x21   :  { %1286 = vmatpush3.bf16.msra.mxu1 %v1524_v31 }
  0x23   :  { %391 = vmatmul.mubr.bf16.vlgmr.msra.gmra.mrb[0].mxu0 %v1525_v32 }
  0x24   :  { %440 = vmatmul.mubr.bf16.vlgmr.msra.gmra.mrb[0].mxu1 %v1528_v34  ;;  %398 = vmatprep.mubr.bf16.mxu0 %v1531_v36 }
  0x25   :  { %1218 = vmatprep.mubr.msk.bf16.mxu1 %vm347_vm1, %v1533_v37 }
  0x26   :  { %19 = vsyncpa [#allocation3], 0  ;;  %v471_v40 = vld [vmem:[%s1926_s2] sm:$0xff]  ;;  %v472_v41 = vld [vmem:[%s1926_s2 + $0x8] sm:$0xff]  ;;  %v1569_v43 = vmov 0.0|0.0   ;;  %v1570_v50 = vmov 0.0   ;;  %v551_v29 = vlaneseq }
  0x27   :  { %v1444_v42 = vpack.c.bf16 %v472_v41, %v471_v40  ;;  %1443 = vmatprep.subr.bf16.mxu0 %v1569_v43  ;;  %1452 = vmatprep.subr.bf16.mxu1 %v1569_v43  ;;  %v473_v44 = vld [vmem:[%s1926_s2 + $0x10] sm:$0xff]  ;;  %v474_v45 = vld [vmem:[%s1926_s2 + $0x18] sm:$0xff]  ;;  %v475_v47 = vld [vmem:[%s1926_s2 + $0x20] sm:$0xff]  ;;  %vm1571_vm2 = vmmov 0   ;;  %vm456_vm3 = vcmask 457728   ;;  %vm462_vm4 = vcmask 453632  }
  0x28   :  { %v1447_v46 = vpack.c.bf16 %v474_v45, %v473_v44  ;;  %v476_v48 = vld [vmem:[%s1926_s2 + $0x28] sm:$0xff]  ;;  %v477_v51 = vld [vmem:[%s1926_s2 + $0x30] sm:$0xff]  ;;  %v552_v30 = vshrl.u32 %v551_v29, 7  ;;  %vm1572_vm5 = vmmov 1   ;;  %vm674_vm7 = vcmask 228352   ;;  %v935_v29 = vld [vmem:[%s1933_s9] sm:$0xff] }
  0x29   :  { %1445 = vmatpush3.bf16.msra.mxu0 %v1444_v42  ;;  %1454 = vmatpush3.bf16.msra.mxu1 %v1444_v42  ;;  %v1450_v49 = vpack.c.bf16 %v476_v48, %v475_v47  ;;  %vm1466_vm6 = vmpackc.low %vm354_vm0, %vm1572_vm5  ;;  %vm837_vm8 = vcmask 64512   ;;  %vm1097_vm9 = vcmask 523264   ;;  %vm946_vm10 = vcmask 261120  }
  0x2a   :  { %1446 = vmatprep.subr.bf16.mxu0 %v1569_v43  ;;  %1455 = vmatprep.subr.bf16.mxu1 %v1569_v43  ;;  %v553_v31 = vsub.s32 0, %v552_v30  ;;  %v936_v30 = vld [vmem:[%s1933_s9 + $0x8] sm:$0xff] }
  0x2b   :  { %399 = vmatmul.mubr.bf16.gmra.mrb[4].mxu0 %v1535_v38 }
  0x2c   :  { %448 = vmatmul.mubr.bf16.gmra.mrb[4].mxu1 %v1536_v39  ;;  %1361 = vmatprep.mubr.msk.f32.mxu0 %vm1571_vm2, %v1570_v50 }
  0x2d   :  { %1448 = vmatpush3.bf16.msra.mxu0 %v1447_v46  ;;  %1457 = vmatpush3.bf16.msra.mxu1 %v1447_v46 }
  0x2e   :  { %1449 = vmatprep.subr.bf16.mxu0 %v1569_v43  ;;  %1458 = vmatprep.subr.bf16.mxu1 %v1569_v43 }
  0x2f   :  { %1378 = vmatprep.mubr.msk.f32.mxu1 %vm1571_vm2, %v1570_v50 }
  0x31   :  { %1451 = vmatpush3.bf16.msra.mxu0 %v1450_v49  ;;  %1460 = vmatpush3.bf16.msra.mxu1 %v1450_v49 }
  0x32   :  { %1359 = vmatprep.subr.mxu0 %v1570_v50  ;;  %1376 = vmatprep.subr.mxu1 %v1570_v50 }
  0x35   :  { %1360 = vmatpush3.msra.mxu0 %v477_v51  ;;  %1377 = vmatpush3.msra.mxu1 %v477_v51 }
  0x36   :  { %1461 = vmatprep.subr.bf16.mxu0 %v1569_v43  ;;  %1468 = vmatprep.subr.bf16.mxu1 %v1569_v43 }
  0xf6   :  { %v1259_v52 = vpop.f32.mrb[0].mxu0 }
  0xf7   :  { %v1287_v53 = vpop.f32.mrb[0].mxu1  ;;  %v1260_v54 = vpop.f32.mrb[1].mxu0 }
  0xf8   :  { %v1261_v55 = vadd.f32 %v1260_v54, %v1259_v52  ;;  %v1288_v56 = vpop.f32.mrb[1].mxu1  ;;  %v1262_v57 = vpop.f32.mrb[2].mxu0 }
  0xf9   :  { %v1289_v58 = vadd.f32 %v1288_v56, %v1287_v53  ;;  %v1290_v59 = vpop.f32.mrb[2].mxu1  ;;  %v1263_v60 = vpop.f32.mrb[3].mxu0 }
  0xfa   :  { %v1264_v61 = vadd.f32 %v1263_v60, %v1262_v57  ;;  %v1291_v62 = vpop.f32.mrb[3].mxu1  ;;  %v753_v60 = vld [vmem:[%s1930_s6 + $0x10] sm:$0xff] }
  0xfb   :  { %v442_v63 = vadd.f32 %v1289_v58, %v1261_v55  ;;  %v1292_v0 = vadd.f32 %v1291_v62, %v1290_v59  ;;  %v751_v58 = vld [vmem:[%s1930_s6] sm:$0xff]  ;;  %v752_v59 = vld [vmem:[%s1930_s6 + $0x8] sm:$0xff]  ;;  %v754_v62 = vld [vmem:[%s1930_s6 + $0x18] sm:$0xff] }
  0xfd   :  { %v445_v1 = vadd.f32 %v1292_v0, %v1264_v61  ;;  %v457_v14 = vsel %vm456_vm3, %v442_v63, 0.0  ;;  %v1469_v61 = vpack.c.bf16 %v752_v59, %v751_v58  ;;  %v755_v0 = vld [vmem:[%s1930_s6 + $0x20] sm:$0xff] }
  0xfe   :  { %v1265_v2 = vpop.f32.mrb[4].mxu0 }
  0xff   :  { %v1293_v3 = vpop.f32.mrb[4].mxu1  ;;  %v1266_v4 = vpop.f32.mrb[5].mxu0  ;;  %v458_v8 = vsel %vm456_vm3, %v445_v1, 0.0 }
 0x100   :  { %v1267_v5 = vadd.f32 %v1266_v4, %v1265_v2  ;;  %v1294_v6 = vpop.f32.mrb[5].mxu1  ;;  %v1268_v7 = vpop.f32.mrb[6].mxu0  ;;  %v459_v17 = vadd.f32 %v458_v8, %v457_v14 }
 0x101   :  { %v1295_v9 = vadd.f32 %v1294_v6, %v1293_v3  ;;  %v1296_v10 = vpop.f32.mrb[6].mxu1  ;;  %v1269_v11 = vpop.f32.mrb[7].mxu0  ;;  %v576_v6 = vld [vmem:[%s1927_s3] sm:$0x1] }
 0x102   :  { %v1270_v12 = vadd.f32 %v1269_v11, %v1268_v7  ;;  %v1297_v13 = vpop.f32.mrb[7].mxu1 }
 0x103   :  { %v450_v15 = vadd.f32 %v1295_v9, %v1267_v5  ;;  %v1298_v16 = vadd.f32 %v1297_v13, %v1296_v10  ;;  %v1221_v10 = vld [vmem:[%s1928_s4] ss:$0 sm:$0xff] }
 0x105   :  { %v460_v18 = vsel %vm456_vm3, %v450_v15, 0.0  ;;  %v453_v19 = vadd.f32 %v1298_v16, %v1270_v12 }
 0x106   :  { %v461_v20 = vadd.f32 %v460_v18, %v459_v17 }
 0x107   :  { %v463_v21 = vsel %vm462_vm4, %v453_v19, 0.0 }
 0x108   :  { %v464_v22 = vadd.f32 %v463_v21, %v461_v20  ;;  %v673_v20 = vld [vmem:[%s1929_s5] sm:$0xff]  ;;  %v757_v21 = vld [vmem:[%s1930_s6 + $0x30] sm:$0xff] }
 0x10a   :  { %v465_v23 = vrot.slane %v464_v22, 4 }
 0x10c   :  { %v466_v24 = vadd.f32 %v465_v23, %v464_v22 }
 0x10e   :  { %v467_v25 = vrot.slane %v466_v24, 2 }
 0x110   :  { %v468_v26 = vadd.f32 %v467_v25, %v466_v24  ;;  %v1537_v24 = vld [vmem:[%s1936_s12] sm:$0xff]   ;;  %v1538_v25 = vld [vmem:[%s1936_s12 + $0x8] sm:$0xff]  }
 0x112   :  { %v469_v27 = vrot.slane %v468_v26, 1 }
 0x114   :  { %v470_v28 = vadd.f32 %v469_v27, %v468_v26  ;;  %v1539_v26 = vld [vmem:[%s1936_s12 + $0x10] sm:$0xff]   ;;  %v1540_v27 = vld [vmem:[%s1936_s12 + $0x18] sm:$0xff]  }
 0x116   :  { %1362 = vmatmul.mubr.msk.f32.vlgmr.msra.gmra.mrb[8].mxu0 %vm456_vm3, %v470_v28  ;;  %v831_v28 = vld [vmem:[%s1931_s7] sm:$0xff] }
 0x117   :  { %1389 = vmatprep.mubr.msk.f32.mxu0 %vm1571_vm2, %v1570_v50 }
 0x1e9   :  { %v547_v32 = vpop.f32.mrb[8].mxu0 }
 0x1ea   :  { %v554_v33 = vrot.slane %v547_v32, %v553_v31  ;;  %v1363_v34 = vpop.f32.mrb[9].mxu0  ;;  %v937_v32 = vld [vmem:[%s1933_s9 + $0x10] sm:$0xff] }
 0x1ec   :  { %v555_v35 = vsub.f32 %v442_v63, %v554_v33  ;;  %v556_v36 = vsub.f32 %v445_v1, %v554_v33  ;;  %v557_v37 = vsub.f32 %v450_v15, %v554_v33  ;;  %v558_v38 = vsub.f32 %v453_v19, %v554_v33  ;;  %v756_v1 = vld [vmem:[%s1930_s6 + $0x28] sm:$0xff]  ;;  %v938_v33 = vld [vmem:[%s1933_s9 + $0x18] sm:$0xff]  ;;  %s1573_s6 = smov [#allocation2]  }
 0x1ed   :  { %v1472_v63 = vpack.c.bf16 %v754_v62, %v753_v60  ;;  %v1475_v2 = vpack.c.bf16 %v756_v1, %v755_v0  ;;  %s1166_s27 = sshll.u32 %s1573_s6, 4  ;;  %s1167_s27 = int_to_ptr.vmem [resolvable:$true] %s1166_s27 }
 0x1ee   :  { %v559_v39 = vmul.f32 %v555_v35, %v555_v35  ;;  %v560_v40 = vmul.f32 %v556_v36, %v556_v36  ;;  %v561_v41 = vmul.f32 %v557_v37, %v557_v37  ;;  %v562_v42 = vmul.f32 %v558_v38, %v558_v38  ;;  %p1550_p1 = scmp.lt.s32.totalorder %s1167_s27, %s1167_s27 }
 0x1f0   :  { %v563_v44 = vsel %vm456_vm3, %v559_v39, 0.0  ;;  %v564_v45 = vsel %vm456_vm3, %v560_v40, 0.0  ;;  %v566_v47 = vsel %vm456_vm3, %v561_v41, 0.0  ;;  %v568_v49 = vsel %vm462_vm4, %v562_v42, 0.0  ;;  %v836_v40 = vld [vmem:[%s1932_s8 + $0x18] sm:$0xff]  ;;  %v1541_v41 = vld [vmem:[%s1935_s11] sm:$0xff]  }
 0x1f1   :  { %v565_v46 = vadd.f32 %v564_v45, %v563_v44  ;;  %v1481_v39 = vpack.c.bf16 %v938_v33, %v937_v32  ;;  %v1542_v42 = vld [vmem:[%s1935_s11 + $0x8] sm:$0xff]  }
 0x1f3   :  { %v567_v48 = vadd.f32 %v566_v47, %v565_v46 }
 0x1f5   :  { %v569_v51 = vadd.f32 %v568_v49, %v567_v48 }
 0x1f7   :  { %v570_v52 = vrot.slane %v569_v51, 4 }
 0x1f9   :  { %v571_v53 = vadd.f32 %v570_v52, %v569_v51 }
 0x1fb   :  { %v572_v54 = vrot.slane %v571_v53, 2 }
 0x1fd   :  { %v573_v55 = vadd.f32 %v572_v54, %v571_v53  ;;  %v1234_v53 = vld [vmem:[%s1937_s13] ss:$0 sm:$0xff] }
 0x1fe   :  { %v1229_v54 = vld [vmem:[%s1934_s10] ss:$0 sm:$0xff]  ;;  %s1545_s10 = scalar_lea.vmem %s1167_s27, 512 }
 0x1ff   :  { %v574_v56 = vrot.slane %v573_v55, 1  ;;  %p1546_p0 = scmp.ne.s32.totalorder %s1167_s27, %s1545_s10  ;;  %p1551_p2 = scmp.lt.s32.totalorder %s1545_s10, %s1545_s10 }
 0x201   :  { %v575_v57 = vadd.f32 %v574_v56, %v573_v55  ;;  %p1552_p3 = por %p1551_p2, %p1550_p1 }
 0x203   :  { %1379 = vmatmul.mubr.msk.f32.vlgmr.msra.gmra.mrb[8].mxu1 %vm456_vm3, %v575_v57  ;;  %p1553_p4 = pnand %p1552_p3, %p1546_p0 }
 0x204   :  { %1406 = vmatprep.mubr.msk.f32.mxu1 %vm1571_vm2, %v1570_v50  ;;  %1470 = vmatpush3.bf16.msra.mxu1 %v1469_v61 }
 0x205   :  { %1471 = vmatprep.subr.bf16.mxu1 %v1569_v43 }
 0x208   :  { %1473 = vmatpush3.bf16.msra.mxu1 %v1472_v63 }
 0x209   :  { %1474 = vmatprep.subr.bf16.mxu1 %v1569_v43 }
 0x20c   :  { %1476 = vmatpush3.bf16.msra.mxu1 %v1475_v2 }
 0x20d   :  { %1404 = vmatprep.subr.mxu1 %v1570_v50 }
 0x210   :  { %1405 = vmatpush3.msra.mxu1 %v757_v21 }
 0x211   :  { %1431 = vmatprep.subr.bf16.mxu1 %v1537_v24 }
 0x2d6   :  { %v646_v3 = vpop.f32.mrb[8].mxu1 }
 0x2d7   :  { %v647_v4 = vadd.f32 1e-05, %v646_v3  ;;  %v1380_v5 = vpop.f32.mrb[9].mxu1 }
 0x2d9   :  { %1543 = vrsqrt.f32 %v647_v4 }
 0x2e3   :  { %v1544_v7 = vpop.eup %1543 }
 0x2e4   :  { %v651_v8 = vmul.f32 %v1544_v7, %v576_v6 }
 0x2e6   :  { %v656_v9 = vrot.slane %v651_v8, %v553_v31 }
 0x2e8   :  { %v658_v11 = vmul.f32 %v656_v9, %v555_v35  ;;  %v659_v12 = vmul.f32 %v656_v9, %v556_v36  ;;  %v660_v13 = vmul.f32 %v656_v9, %v557_v37  ;;  %v661_v14 = vmul.f32 %v656_v9, %v558_v38  ;;  %v834_v37 = vld [vmem:[%s1932_s8 + $0x8] sm:$0xff]  ;;  %v835_v38 = vld [vmem:[%s1932_s8 + $0x10] sm:$0xff] }
 0x2e9   :  { %v1477_v36 = vpack.c.bf16 %v936_v30, %v935_v29 }
 0x2ea   :  { %v669_v50 = vadd.f32 %v1221_v10, %v658_v11  ;;  %v670_v15 = vadd.f32 %v1221_v10, %v659_v12  ;;  %v671_v17 = vadd.f32 %v1221_v10, %v660_v13  ;;  %v672_v18 = vadd.f32 %v1221_v10, %v661_v14 }
 0x2ec   :  { %v1462_v16 = vpack.c.bf16 %v670_v15, %v669_v50  ;;  %v1465_v19 = vpack.c.bf16 %v672_v18, %v671_v17 }
 0x2ee   :  { %1463 = vmatpush3.bf16.msra.mxu0 %v1462_v16 }
 0x2ef   :  { %1464 = vmatprep.subr.bf16.mxu0 %v1569_v43  ;;  %v833_v43 = vld [vmem:[%s1932_s8] sm:$0xff] }
 0x2f2   :  { %1467 = vmatpush3.bf16.msk.msra.mxu0 %vm1466_vm6, %v1465_v19 }
 0x2f5   :  { %1390 = vmatmul.mubr.msk.f32.vlgmr.msra.gmra.mrb[10].mxu0 %vm674_vm7, %v673_v20 }
 0x2f6   :  { %1411 = vmatprep.mubr.msk.f32.mxu0 %vm837_vm8, %v833_v43 }
 0x3c8   :  { %v747_v22 = vpop.f32.mrb[10].mxu0 }
 0x3c9   :  { %v1391_v23 = vpop.f32.mrb[11].mxu0  ;;  %1407 = vmatmul.mubr.msk.f32.vlgmr.msra.gmra.mrb[10].mxu1 %vm456_vm3, %v747_v22 }
 0x3ca   :  { %1432 = vmatpush3.bf16.msra.mxu1 %v1537_v24  ;;  %1439 = vmatprep.mubr.msk.bf16.mxu1 %vm1097_vm9, %v1541_v41 }
 0x3cb   :  { %1433 = vmatprep.subr.bf16.mxu1 %v1538_v25 }
 0x3ce   :  { %1434 = vmatpush3.bf16.msra.mxu1 %v1538_v25 }
 0x3cf   :  { %1435 = vmatprep.subr.bf16.mxu1 %v1539_v26 }
 0x3d2   :  { %1436 = vmatpush3.bf16.msra.mxu1 %v1539_v26 }
 0x3d3   :  { %1437 = vmatprep.subr.bf16.mxu1 %v1540_v27 }
 0x3d6   :  { %1438 = vmatpush3.bf16.msra.mxu1 %v1540_v27 }
 0x3d9   :  { %1440 = vmatmul.mubr.msk.bf16.vlgmr.msra.gmra.mrb[12].mxu1 %vm1097_vm9, %v1542_v42 }
 0x49c   :  { %v827_v31 = vpop.f32.mrb[10].mxu1 }
 0x49d   :  { %v832_v34 = vmul.f32 %v831_v28, %v827_v31  ;;  %v1408_v35 = vpop.f32.mrb[11].mxu1 }
 0x49f   :  { %1409 = vmatprep.subr.mxu0 %v832_v34 }
 0x4a0   :  { %1410 = vmatpush3.msra.mxu0 %v832_v34 }
 0x4a1   :  { %1412 = vmatmul.mubr.msk.f32.vlgmr.msra.gmra.mrb[12].mxu0 %vm837_vm8, %v834_v37  ;;  %1478 = vmatprep.subr.bf16.mxu0 %v1477_v36 }
 0x4a2   :  { %1414 = vmatprep.mubr.msk.f32.mxu0 %vm837_vm8, %v835_v38  ;;  %1480 = vmatpush3.bf16.msra.mxu0 %v1477_v36 }
 0x4a3   :  { %1482 = vmatprep.subr.bf16.mxu0 %v1481_v39 }
 0x4a5   :  { %1415 = vmatmul.mubr.msk.f32.gmra.mrb[14].mxu0 %vm837_vm8, %v836_v40 }
 0x4a6   :  { %1484 = vmatpush3.bf16.msra.mxu0 %v1481_v39 }
 0x4ac   :  { %v1441_v48 = vpop.f32.mrb[12].mxu1 }
 0x4ad   :  { %v1138_v49 = vpop.f32.mrb[13].mxu1  ;;  %v1147_v3 = vadd.f32 %v1441_v48, %v1234_v53 }
 0x4ae   :  { %v1442_v51 = vpop.f32.mrb[14].mxu1  ;;  %v1139_v56 = vadd.f32 %v1234_v53, %v1138_v49 }
 0x4af   :  { %v1141_v52 = vpop.f32.mrb[15].mxu1  ;;  %v1150_v0 = vadd.f32 %v1442_v51, %v1234_v53 }
 0x4b0   :  { %v1142_v55 = vadd.f32 %v1234_v53, %v1141_v52 }
 0x574   :  { %v1413_v44 = vpop.f32.mrb[12].mxu0 }
 0x575   :  { %v916_v45 = vpop.f32.mrb[13].mxu0 }
 0x576   :  { %1425 = vmatprep.mubr.msk.f32.mxu0 %vm946_vm10, %v916_v45 }
 0x577   :  { %1426 = vmatmul.mubr.msk.f32.vlgmr.msra.gmra.mrb[16].mxu0 %vm946_vm10, %v1413_v44 }
 0x578   :  { %v1416_v46 = vpop.f32.mrb[14].mxu0 }
 0x579   :  { %v926_v47 = vpop.f32.mrb[15].mxu0 }
 0x57a   :  { %1428 = vmatprep.mubr.msk.f32.mxu0 %vm946_vm10, %v926_v47 }
 0x57b   :  { %1429 = vmatmul.mubr.msk.f32.gmra.mrb[18].mxu0 %vm946_vm10, %v1416_v46 }
 0x64a   :  { %v1427_v57 = vpop.f32.mrb[16].mxu0 }
 0x64b   :  { %v1031_v58 = vadd.f32 %v1427_v57, %v1229_v54  ;;  %v1025_v59 = vpop.f32.mrb[17].mxu0 }
 0x64c   :  { %v1026_v60 = vadd.f32 %v1229_v54, %v1025_v59 }
 0x64d   :  { %v1154_v61 = vmul.f32 %v1142_v55, %v1031_v58 }
 0x64e   :  { %v1153_v62 = vmul.f32 %v1139_v56, %v1026_v60  ;;  %v1430_v63 = vpop.f32.mrb[18].mxu0 }
 0x64f   :  { %1158 = vst [vmem:[#allocation2 + $0x8] sm:$0xff] %v1154_v61  ;;  %v1041_v1 = vadd.f32 %v1430_v63, %v1229_v54  ;;  %v1035_v2 = vpop.f32.mrb[19].mxu0 }
 0x650   :  { %1157 = vst [vmem:[#allocation2] sm:$0xff] %v1153_v62  ;;  %v1036_v4 = vadd.f32 %v1229_v54, %v1035_v2 }
 0x651   :  { %v1156_v5 = vmul.f32 %v1150_v0, %v1041_v1 }
 0x652   :  { %v1155_v6 = vmul.f32 %v1147_v3, %v1036_v4 }
 0x653   :  { %1160 = vst [vmem:[#allocation2 + $0x18] sm:$0xff] %v1156_v5 }
 0x654   :  { %1159 = vst [vmem:[#allocation2 + $0x10] sm:$0xff] %v1155_v6 }
 0x655   :  { %1556 = shalt.err (!%p1553_p4)
}
 0x656   :  { %s1557_s29 = scalar_lea.hbm %s1938_s14, 512 }
 0x657   :  { %p1558_p5 = scmp.ne.s32.totalorder %s1938_s14, %s1557_s29  ;;  %p1561_p6 = scmp.lt.u32.totalorder %s1557_s29, %s1938_s14 }
 0x659   :  { %p1563_p7 = pnand %p1561_p6, %p1558_p5 }
 0x65b   :  { %1566 = shalt.err (!%p1563_p7)
}
 0x65c   :  { %s1574_s17 = smov 128   ;;  %s1575_s18 = smov 8  }
 0x65d   :  { %1172 = dma.vmem_to_hbm [thread:$0]  %s1167_s27, 512, %s1938_s14, [#allocation3], %s1574_s17, %s1574_s17, %s1575_s18  }
 0x65e   :  { %1567 = dma.done.wait [#allocation3], 512  }
 0x65f   :  { %1568 = vsyncadd [#allocation3], 4294966784 }
 0x660   :  { %1176 = vsyncpa [#allocation3], 1 }

</bundles_post_ra>
